<compile_context>
chip_gen: v6e
topology: v6e:2x2x1
jax: 0.10.0
libtpu: 0.0.40
codegen_flags: <defaults>
</compile_context>

<pallas_src>
import math

import jax
import jax.numpy as jnp
from jax.experimental import pallas as pl
from jax.experimental.pallas import tpu as pltpu


def _copy_kernel(x_ref, o_ref):
    # Pure lane-dense tile copy: one vld / one vst per vreg, fully pipelined
    # (double-buffered inbound/outbound DMA) by the BlockSpec machinery.
    o_ref[...] = x_ref[...]


def _largest_aligned_divisor(total: int, align: int, cap: int):
    """Largest multiple of `align` that divides `total` and is <= cap, else None."""
    best = None
    b = align
    while b <= min(total, cap):
        if total % b == 0:
            best = b
        b += align
    return best


def flatten_reference(x):
    """Metadata-only flatten — strictly fastest when not fusing with other ops."""
    return x.reshape(x.shape[0], -1)


def flatten(x, *, target_tile_bytes=4 * 1024 * 1024, max_lane_block=4096,
            donate_input=False):
    """Pallas equivalent of PyTorch Flatten: (N, ...) -> (N, prod(...)).

    Matches `input.view(N, -1)` semantics (a 1-D input of size N yields (N, 1)).
    """
    n = x.shape[0]
    flat = math.prod(x.shape[1:]) if x.ndim > 1 else 1
    total = n * flat
    itemsize = jnp.dtype(x.dtype).itemsize
    # Sublane alignment by dtype packing: f32 -> 8, bf16 -> 16, i8 -> 32.
    sublane_align = max(8, 32 // itemsize)

    def _row_block(rows: int, lane_block: int, min_steps: int = 8) -> int:
        """Sublane-aligned row block from a per-tile byte budget; keep >=
        `min_steps` grid steps when the input is large enough (v7x megacore +
        DMA/compute overlap)."""
        if rows <= sublane_align:
            return rows  # full dim — always a legal block shape
        budget = max(1, target_tile_bytes // (lane_block * itemsize))
        rb = max(sublane_align,
                 (min(budget, rows) // sublane_align) * sublane_align)
        if rows // rb < min_steps and rows >= min_steps * sublane_align:
            rb = max(sublane_align,
                     ((rows // min_steps) // sublane_align) * sublane_align)
        return rb

    # --- choose the slab the kernel sees (wrapper reshapes are free) -------
    L = _largest_aligned_divisor(total, 128, max_lane_block)
    if L is not None:
        # Lane-dense re-slab: every tile is one contiguous HBM chunk of
        # row_block * L elements — best case for the DMA engine, unmasked vst.
        rows = total // L
        x2 = x.reshape(rows, L)
        lane_block = L
        row_block = _row_block(rows, lane_block)
        grid = (pl.cdiv(rows, row_block),)
        index_map = lambda i: (i, 0)
        semantics = ("parallel",)
        slab_shape = (rows, L)
    else:
        # total not a multiple of 128: keep the (n, flat) slab and let the
        # cdiv grid mask only the ragged edge blocks (never a whole-axis tile).
        x2 = x.reshape(n, flat)
        if flat >= 128:
            lane_block = min(max_lane_block, (flat // 128) * 128)
        else:
            lane_block = flat  # < 128 lanes: full dim is the only legal choice
        row_block = _row_block(n, lane_block)
        grid = (pl.cdiv(n, row_block), pl.cdiv(flat, lane_block))
        index_map = lambda i, j: (i, j)
        semantics = ("parallel", "parallel")
        slab_shape = (n, flat)

    tile_bytes = row_block * lane_block * itemsize
    # >= 4x tile (double-buffered in + out) with 2x headroom; never below
    # 32 MiB (v5e scoped default is 16 MiB), never above 48 MiB (v7x has only
    # 64 MiB physical VMEM per TensorCore).
    vmem_limit = int(max(32 << 20, min(48 << 20, 8 * tile_bytes)))

    spec = pl.BlockSpec((row_block, lane_block), index_map)
    out2 = pl.pallas_call(
        _copy_kernel,
        out_shape=jax.ShapeDtypeStruct(slab_shape, x.dtype),
        grid=grid,
        in_specs=[spec],
        out_specs=spec,
        # Optional aliasing (only useful if the caller donates the input);
        # halves peak HBM footprint for what is a byte-identical copy.
        input_output_aliases=({0: 0} if donate_input else {}),
        # Tell XLA this is a pure mem-bound op so it can schedule around it.
        cost_estimate=pl.CostEstimate(
            flops=0, transcendentals=0, bytes_accessed=2 * total * itemsize),
        compiler_params=pltpu.CompilerParams(
            dimension_semantics=semantics,
            vmem_limit_bytes=vmem_limit,
        ),
    )(x2)

    # Free metadata-only reshape back to the PyTorch output shape.
    return out2.reshape(n, flat)


if __name__ == "__main__":
    key = jax.random.PRNGKey(0)
    # Small NCHW conv-activation-like shape consistent with the module.
    x = jax.random.normal(key, (2, 4, 16, 16), dtype=jnp.float32)

    out = flatten(x)
    out = jax.block_until_ready(out)

    ref = flatten_reference(x)  # same semantics as torch .view(N, -1)
    assert out.shape == (2, 4 * 16 * 16)
    assert out.dtype == x.dtype
    assert jnp.array_equal(out, ref)

    # Also exercise the ragged (total not a multiple of 128) fallback path.
    x_odd = jax.random.normal(jax.random.PRNGKey(0), (3, 5, 7, 7),
                              dtype=jnp.float32)
    out_odd = jax.block_until_ready(flatten(x_odd))
    assert out_odd.shape == (3, 5 * 7 * 7)
    assert jnp.array_equal(out_odd, flatten_reference(x_odd))

    print("KERNEL_OK")
</pallas_src>

<mosaic_0001>
module attributes {stable_mosaic.version = 11 : i64} {
  func.func @_copy_kernel(%arg0: i32, %arg1: memref<1x2048xf32, #tpu.memory_space<vmem>>, %arg2: memref<1x2048xf32, #tpu.memory_space<vmem>>) attributes {dimension_semantics = [#tpu.dimension_semantics<parallel>], iteration_bounds = array<i64: 1>, scalar_prefetch = 0 : i64, scratch_operands = 0 : i64, tpu.core_type = #tpu.core_type<tc>, window_params = [{transform_indices = @transform_0, window_bounds = array<i64: 1, 2048>}, {transform_indices = @transform_1, window_bounds = array<i64: 1, 2048>}]} {
    %c0 = arith.constant 0 : index
    %c0_0 = arith.constant 0 : index
    %0 = vector.load %arg1[%c0, %c0_0] : memref<1x2048xf32, #tpu.memory_space<vmem>>, vector<1x2048xf32>
    %c0_1 = arith.constant 0 : index
    %c0_2 = arith.constant 0 : index
    %1 = vector.load %arg2[%c0_1, %c0_2] : memref<1x2048xf32, #tpu.memory_space<vmem>>, vector<1x2048xf32>
    tpu.vector_store %arg2[%c0_1, %c0_2], %0 {strides = array<i32>} : memref<1x2048xf32, #tpu.memory_space<vmem>>, vector<1x2048xf32>,
    return
  }
  func.func @transform_0(%arg0: i32) -> (i32, i32) {
    %c0_i32 = arith.constant 0 : i32
    %c0_i32_0 = arith.constant 0 : i32
    return %arg0, %c0_i32 : i32, i32
  }
  func.func @transform_1(%arg0: i32) -> (i32, i32) {
    %c0_i32 = arith.constant 0 : i32
    %c0_i32_0 = arith.constant 0 : i32
    return %arg0, %c0_i32 : i32, i32
  }
}

</mosaic_0001>

<bundles_post_ra>
// kernel: tpu_custom_call.1
= control target key start
LH: loop header
LB: loop body
LE: loop exit
PB: predicated region body
PF: predicated region fallthrough
CT: control target
= control target key end

     0   :  { %6 = vsyncpa [#allocation3], 0  ;;  %s104_s0 = inlined_call_operand.hbm [shape: f32[1,2048], index: 0, kind: input, shape index: {}]   ;;  %s105_s1 = inlined_call_operand.hbm [shape: f32[1,2048], index: 1, kind: output, shape index: {}]  }
   0x1   :  { %7 = vsyncpa [#allocation4], 0  ;;  %s86_s6 = smov [#allocation2]  }
   0x2   :  { %s14_s7 = sshll.u32 %s86_s6, 4  ;;  %s15_s7 = int_to_ptr.vmem [resolvable:$true] %s14_s7 }
   0x3   :  { %s50_s8 = scalar_lea.vmem %s15_s7, 256  ;;  %p55_p1 = scmp.lt.s32.totalorder %s15_s7, %s15_s7 }
   0x4   :  { %p51_p0 = scmp.ne.s32.totalorder %s15_s7, %s50_s8  ;;  %p56_p2 = scmp.lt.s32.totalorder %s50_s8, %s50_s8 }
   0x6   :  { %p57_p3 = por %p56_p2, %p55_p1 }
   0x8   :  { %p58_p4 = pnand %p57_p3, %p51_p0 }
   0xa   :  { %61 = shalt.err (!%p58_p4)
}
   0xb   :  { %17 = dma.hbm_to_vmem [thread:$0]  %s104_s0, 256, %s15_s7, [#allocation3]  }
   0xc   :  { %82 = dma.done.wait [#allocation3], 256  }
   0xd   :  { %83 = vsyncadd [#allocation3], 4294967040  ;;  %s87_s11 = smov [#allocation5]   ;;  %v21_v0 = vld [vmem:[#allocation2] sm:$0xff]  ;;  %v22_v1 = vld [vmem:[#allocation2 + $0x8] sm:$0xff] }
   0xe   :  { %s31_s12 = sshll.u32 %s87_s11, 4  ;;  %23 = vst [vmem:[#allocation5] sm:$0xff] %v21_v0  ;;  %24 = vst [vmem:[#allocation5 + $0x8] sm:$0xff] %v22_v1  ;;  %s32_s12 = int_to_ptr.vmem [resolvable:$true] %s31_s12 }
   0xf   :  { %s62_s13 = scalar_lea.vmem %s32_s12, 256  ;;  %p67_p6 = scmp.lt.s32.totalorder %s32_s12, %s32_s12 }
  0x10   :  { %p63_p5 = scmp.ne.s32.totalorder %s32_s12, %s62_s13  ;;  %p68_p7 = scmp.lt.s32.totalorder %s62_s13, %s62_s13 }
  0x12   :  { %p69_p8 = por %p68_p7, %p67_p6 }
  0x14   :  { %p70_p9 = pnand %p69_p8, %p63_p5 }
  0x16   :  { %73 = shalt.err (!%p70_p9)
}
  0x17   :  { %34 = dma.vmem_to_hbm [thread:$0]  %s32_s12, 256, %s105_s1, [#allocation4]  }
  0x18   :  { %84 = dma.done.wait [#allocation4], 256  }
  0x19   :  { %85 = vsyncadd [#allocation4], 4294967040 }
  0x1a   :  { %38 = vsyncpa [#allocation3], 1 }
  0x1b   :  { %39 = vsyncpa [#allocation4], 1 }

</bundles_post_ra>
